<compile_context>
chip_gen: v6e
topology: v6e:2x2x1
jax: 0.10.0
libtpu: 0.0.40
codegen_flags: <defaults>
</compile_context>

<pallas_src>
import jax
import jax.numpy as jnp
import numpy as np
from jax.experimental import pallas as pl
from jax.experimental.pallas import tpu as pltpu

C_IN = 300
C_MID = 10
K = 3
PAD = 2
L_IN = 4                        # forced by the threshold loop in forward()
L1 = L_IN + 2 * PAD - (K - 1)   # 6 conv1 output positions
POOL_C = C_MID // 2             # 5 pooled channels (== input_layer of conv2)
POOL_W = L1 // 2                # 3 pooled positions
F_IN = C_IN * L_IN              # 1200 flattened input features per sample
N_COL = 4 * POOL_W * POOL_C     # 60 fused conv1 output columns (4 parities x 15)
N_POOL = POOL_W * POOL_C        # 15 pooled values per sample


def _round_up(x, m):
    return ((x + m - 1) // m) * m


def cnn_kernel(x_ref, w1_ref, b1_ref, w2_ref, b2_ref, out_ref):
    # conv1 (all 6 positions x 10 channels, zero-padding folded into the
    # weights) as a single MXU matmul with f32 accumulation.
    h = jnp.dot(x_ref[...], w1_ref[...],
                preferred_element_type=jnp.float32)            # (bn, 60) f32
    h = jnp.maximum(h + b1_ref[...], 0.0)                      # bias + ReLU
    # MaxPool2d(2): the 60 columns are laid out as 4 parity groups of 15
    # pooled-(position, channel) pairs, so the 2x2 pool is 3 lane-slice maxima
    # (pure VPU work).
    pool = jnp.maximum(jnp.maximum(h[:, 0:N_POOL], h[:, N_POOL:2 * N_POOL]),
                       jnp.maximum(h[:, 2 * N_POOL:3 * N_POOL],
                                   h[:, 3 * N_POOL:]))          # (bn, 15)
    # conv2 == weighted sum of the 15 pooled values.  Doing it as
    # (8,15) @ (bn,15)^T puts samples on the LANE axis, so the store is
    # lane-dense; only row 0 is kept (rows are identical copies of w2).
    y = jnp.einsum("ok,nk->on", w2_ref[...], pool,
                   preferred_element_type=jnp.float32)          # (8, bn)
    y = y[0:1, :] + b2_ref[0, 0]                                # (1, bn)
    # threshold: 1.0 if > 0.5 else 0.0 (vectorized form of the python loop)
    out_ref[...] = jnp.where(y > 0.5, 1.0, 0.0).astype(out_ref.dtype)


def cnn_forward(x, params, block_n=4096):
    """x: (N, 300, 4) float32 (or bfloat16), channels-first like PyTorch Conv1d."""
    w1, b1, w2, b2 = params
    N, C, L = x.shape
    assert C == C_IN and L == L_IN
    assert block_n % 128 == 0 and block_n > 0

    # ---- static (numpy) index math for the fused conv1 weight matrix ----
    # column j = g*15 + w*5 + c computes conv1 output (t = 2w + g//2,
    # o = 2c + g%2); the 4 groups g are the 2x2 pooling partners.
    cols = np.arange(N_COL)
    g = cols // N_POOL
    rem = cols % N_POOL
    wpos = rem // POOL_C
    cch = rem % POOL_C
    t = 2 * wpos + g // 2                      # conv1 output position 0..5
    o = 2 * cch + g % 2                        # conv1 output channel 0..9

    rows = np.arange(F_IN)                     # flattened input feature c*4 + p
    cin = rows // L_IN
    pin = rows % L_IN
    k = pin[:, None] - t[None, :] + PAD        # kernel tap, (1200, 60)
    valid = (k >= 0) & (k < K)                 # zero-padding folded in here
    kc = np.clip(k, 0, K - 1)
    o_mat = np.broadcast_to(o[None, :], (F_IN, N_COL))
    c_mat = np.broadcast_to(cin[:, None], (F_IN, N_COL))

    w1_big = jnp.where(jnp.asarray(valid), w1[o_mat, c_mat, kc], 0.0)
    w1_big = w1_big.astype(x.dtype)            # (1200, 60): f32, or bf16 if x is bf16
    b1_col = b1[o].reshape(1, N_COL).astype(jnp.float32)      # (1, 60)

    j = np.arange(N_POOL)
    w2_flat = w2[0, j % POOL_C, j // POOL_C]                  # w2[0,c,w] at w*5+c
    w2_b = jnp.broadcast_to(w2_flat[None, :], (8, N_POOL)).astype(jnp.float32)
    b2_s = b2.reshape(1, 1).astype(jnp.float32)               # SMEM scalar

    # ---- batch tiling: cdiv grid, ragged final block, weights stay resident ----
    bn = min(block_n, _round_up(N, 8))          # bn < block_n only when grid_n == 1
    grid_n = pl.cdiv(N, bn)
    xf = x.reshape(N, F_IN)                     # free reshape; no dtype copy, no pad

    flops = 2 * grid_n * bn * (F_IN * N_COL + 8 * N_POOL)
    bytes_accessed = (grid_n * bn * F_IN * xf.dtype.itemsize   # activation read
                      + grid_n * bn * 2                        # bf16 output write
                      + F_IN * N_COL * w1_big.dtype.itemsize)  # resident weights

    out = pl.pallas_call(
        cnn_kernel,
        grid=(grid_n,),
        in_specs=[
            pl.BlockSpec((bn, F_IN), lambda i: (i, 0)),        # activations (tiled)
            pl.BlockSpec((F_IN, N_COL), lambda i: (0, 0)),     # fused conv1 weights
            pl.BlockSpec((1, N_COL), lambda i: (0, 0)),        # conv1 bias
            pl.BlockSpec((8, N_POOL), lambda i: (0, 0)),       # conv2 weights
            pl.BlockSpec(memory_space=pltpu.MemorySpace.SMEM), # conv2 bias scalar
        ],
        out_specs=pl.BlockSpec((1, bn), lambda i: (0, i)),     # lane-dense output
        out_shape=jax.ShapeDtypeStruct((1, grid_n * bn), jnp.bfloat16),
        compiler_params=pltpu.CompilerParams(
            dimension_semantics=("parallel",),                 # v7x: shard across TCs
            vmem_limit_bytes=56 * 1024 * 1024),                # under 64 MiB/TC (v7x)
        cost_estimate=pl.CostEstimate(
            flops=flops, transcendentals=0, bytes_accessed=bytes_accessed),
    )(xf, w1_big, b1_col, w2_b, b2_s)

    # Tail columns beyond N (ragged final block) hold garbage and are dropped
    # here; do not consume the raw kernel output directly.
    return out[0, :N].astype(jnp.float32).reshape(N, 1, 1)     # PyTorch output shape


def reference(x, params):
    """Pure-JAX f32 reference of the PyTorch forward. Returns (0/1 output, pre-threshold z)."""
    w1, b1, w2, b2 = params
    N = x.shape[0]
    xp = jnp.pad(x, ((0, 0), (0, 0), (PAD, PAD)))
    y = jnp.stack(
        [jnp.einsum("nck,ock->no", xp[:, :, t:t + K], w1,
                    precision=jax.lax.Precision.HIGHEST) for t in range(L1)],
        axis=-1) + b1[None, :, None]                          # (N, 10, 6)
    y = jnp.maximum(y, 0.0)
    p = y.reshape(N, POOL_C, 2, POOL_W, 2).max(axis=(2, 4))   # (N, 5, 3)
    z = jnp.einsum("nck,ock->no", p, w2,
                   precision=jax.lax.Precision.HIGHEST) + b2  # (N, 1)
    return jnp.where(z > 0.5, 1.0, 0.0).reshape(N, 1, 1), z.reshape(N, 1, 1)


def init_params(key):
    """Deterministic init matching PyTorch Conv1d default shapes."""
    k1, k2, k3, k4 = jax.random.split(key, 4)
    bound1 = 1.0 / (C_IN * K) ** 0.5
    bound2 = 1.0 / (POOL_C * K) ** 0.5
    w1 = jax.random.uniform(k1, (C_MID, C_IN, K), jnp.float32, -bound1, bound1)
    b1 = jax.random.uniform(k2, (C_MID,), jnp.float32, -bound1, bound1)
    w2 = jax.random.uniform(k3, (1, POOL_C, K), jnp.float32, -bound2, bound2)
    b2 = jax.random.uniform(k4, (1,), jnp.float32, -bound2, bound2)
    return w1, b1, w2, b2


if __name__ == "__main__":
    key = jax.random.PRNGKey(0)
    kp, kx = jax.random.split(key)
    params = init_params(kp)

    def check(n, **kw):
        xs = jax.random.normal(jax.random.fold_in(kx, n), (n, C_IN, L_IN),
                               jnp.float32)
        out = jax.block_until_ready(cnn_forward(xs, params, **kw))
        ref_out, ref_z = reference(xs, params)
        ref_out = jax.block_until_ready(ref_out)
        assert out.shape == (n, 1, 1)
        # Samples whose conv2 output sits within 1e-2 of the 0.5 threshold can
        # legitimately flip between MXU and XLA f32 summation orders; only
        # assert on clearly-decided samples (and require that some exist).
        decided = jnp.abs(ref_z - 0.5) > 1e-2
        assert bool(jnp.any(decided)), n
        assert bool(jnp.all(jnp.where(decided, out == ref_out, True))), n

    check(2)                    # tiny batch, single (partial) block, lane width 8
    check(300, block_n=128)     # multi-block grid with a ragged final block
    check(1024)                 # one full 1024-row tile
    print("KERNEL_OK")
</pallas_src>

<mosaic_0001>
module attributes {stable_mosaic.version = 11 : i64} {
  func.func @cnn_kernel(%arg0: i32, %arg1: memref<8x1200xf32, #tpu.memory_space<vmem>>, %arg2: memref<1200x60xf32, #tpu.memory_space<vmem>>, %arg3: memref<1x60xf32, #tpu.memory_space<vmem>>, %arg4: memref<8x15xf32, #tpu.memory_space<vmem>>, %arg5: memref<1x1xf32, #tpu.memory_space<smem>>, %arg6: memref<1x8xbf16, #tpu.memory_space<vmem>>) attributes {dimension_semantics = [#tpu.dimension_semantics<parallel>], iteration_bounds = array<i64: 1>, scalar_prefetch = 0 : i64, scratch_operands = 0 : i64, tpu.core_type = #tpu.core_type<tc>, window_params = [{transform_indices = @transform_0, window_bounds = array<i64: 8, 1200>}, {pipeline_mode = #tpu.pipeline_mode<synchronous>, transform_indices = @transform_1, window_bounds = array<i64: 1200, 60>}, {pipeline_mode = #tpu.pipeline_mode<synchronous>, transform_indices = @transform_2, window_bounds = array<i64: 1, 60>}, {pipeline_mode = #tpu.pipeline_mode<synchronous>, transform_indices = @transform_3, window_bounds = array<i64: 8, 15>}, {transform_indices = @transform_4, window_bounds = array<i64: 1, 1>}, {transform_indices = @transform_5, window_bounds = array<i64: 1, 8>}]} {
    %c0 = arith.constant 0 : index
    %c0_0 = arith.constant 0 : index
    %0 = vector.load %arg1[%c0, %c0_0] : memref<8x1200xf32, #tpu.memory_space<vmem>>, vector<8x1200xf32>
    %c0_1 = arith.constant 0 : index
    %c0_2 = arith.constant 0 : index
    %1 = vector.load %arg2[%c0_1, %c0_2] : memref<1200x60xf32, #tpu.memory_space<vmem>>, vector<1200x60xf32>
    %cst = arith.constant dense<0.000000e+00> : vector<8x60xf32>
    %2 = tpu.matmul %0, %1, %cst {dimension_numbers = #tpu.dot_dimension_numbers<[1], [0], [0], [1], [0, 0, 1, 1], [], []>} : vector<8x1200xf32>, vector<1200x60xf32>, vector<8x60xf32> -> vector<8x60xf32>
    %c0_3 = arith.constant 0 : index
    %c0_4 = arith.constant 0 : index
    %3 = vector.load %arg3[%c0_3, %c0_4] : memref<1x60xf32, #tpu.memory_space<vmem>>, vector<1x60xf32>
    %4 = vector.broadcast %3 : vector<1x60xf32> to vector<8x60xf32>
    %5 = arith.addf %2, %4 : vector<8x60xf32>
    %cst_5 = arith.constant 0.000000e+00 : f32
    %6 = vector.broadcast %cst_5 : f32 to vector<8x60xf32>
    %7 = arith.maximumf %5, %6 : vector<8x60xf32>
    %8 = vector.extract_strided_slice %7 {offsets = [0, 0], sizes = [8, 15], strides = [1, 1]} : vector<8x60xf32> to vector<8x15xf32>
    %9 = vector.extract_strided_slice %7 {offsets = [0, 15], sizes = [8, 15], strides = [1, 1]} : vector<8x60xf32> to vector<8x15xf32>
    %10 = arith.maximumf %8, %9 : vector<8x15xf32>
    %11 = vector.extract_strided_slice %7 {offsets = [0, 30], sizes = [8, 15], strides = [1, 1]} : vector<8x60xf32> to vector<8x15xf32>
    %12 = vector.extract_strided_slice %7 {offsets = [0, 45], sizes = [8, 15], strides = [1, 1]} : vector<8x60xf32> to vector<8x15xf32>
    %13 = arith.maximumf %11, %12 : vector<8x15xf32>
    %14 = arith.maximumf %10, %13 : vector<8x15xf32>
    %c0_6 = arith.constant 0 : index
    %c0_7 = arith.constant 0 : index
    %15 = vector.load %arg4[%c0_6, %c0_7] : memref<8x15xf32, #tpu.memory_space<vmem>>, vector<8x15xf32>
    "tpu.trace_start"() <{level = 10 : i32, message = "ok,nk->on"}> : () -> ()
    %cst_8 = arith.constant dense<0.000000e+00> : vector<8x8xf32>
    %16 = tpu.matmul %15, %14, %cst_8 {dimension_numbers = #tpu.dot_dimension_numbers<[1], [1], [0], [0], [0, 0, 1, 0], [], []>} : vector<8x15xf32>, vector<8x15xf32>, vector<8x8xf32> -> vector<8x8xf32>
    "tpu.trace_stop"() : () -> ()
    %17 = vector.extract_strided_slice %16 {offsets = [0, 0], sizes = [1, 8], strides = [1, 1]} : vector<8x8xf32> to vector<1x8xf32>
    %c0_9 = arith.constant 0 : index
    %c0_10 = arith.constant 0 : index
    %18 = memref.load %arg5[%c0_9, %c0_10] : memref<1x1xf32, #tpu.memory_space<smem>>
    %19 = vector.broadcast %18 : f32 to vector<1x8xf32>
    %20 = arith.addf %17, %19 : vector<1x8xf32>
    %cst_11 = arith.constant 5.000000e-01 : f32
    %21 = vector.broadcast %cst_11 : f32 to vector<1x8xf32>
    %22 = arith.cmpf ogt, %20, %21 : vector<1x8xf32>
    %cst_12 = arith.constant 1.000000e+00 : f32
    %cst_13 = arith.constant 0.000000e+00 : f32
    %23 = vector.broadcast %cst_12 : f32 to vector<1x8xf32>
    %24 = vector.broadcast %cst_13 : f32 to vector<1x8xf32>
    %25 = arith.select %22, %23, %24 : vector<1x8xi1>, vector<1x8xf32>
    %26 = arith.truncf %25 : vector<1x8xf32> to vector<1x8xbf16>
    %c0_14 = arith.constant 0 : index
    %c0_15 = arith.constant 0 : index
    %27 = vector.load %arg6[%c0_14, %c0_15] : memref<1x8xbf16, #tpu.memory_space<vmem>>, vector<1x8xbf16>
    tpu.vector_store %arg6[%c0_14, %c0_15], %26 {strides = array<i32>} : memref<1x8xbf16, #tpu.memory_space<vmem>>, vector<1x8xbf16>,
    return
  }
  func.func @transform_0(%arg0: i32) -> (i32, i32) {
    %c0_i32 = arith.constant 0 : i32
    %c0_i32_0 = arith.constant 0 : i32
    return %arg0, %c0_i32 : i32, i32
  }
  func.func @transform_1(%arg0: i32) -> (i32, i32) {
    %c0_i32 = arith.constant 0 : i32
    %c0_i32_0 = arith.constant 0 : i32
    %c0_i32_1 = arith.constant 0 : i32
    return %c0_i32, %c0_i32_0 : i32, i32
  }
  func.func @transform_2(%arg0: i32) -> (i32, i32) {
    %c0_i32 = arith.constant 0 : i32
    %c0_i32_0 = arith.constant 0 : i32
    %c0_i32_1 = arith.constant 0 : i32
    return %c0_i32, %c0_i32_0 : i32, i32
  }
  func.func @transform_3(%arg0: i32) -> (i32, i32) {
    %c0_i32 = arith.constant 0 : i32
    %c0_i32_0 = arith.constant 0 : i32
    %c0_i32_1 = arith.constant 0 : i32
    return %c0_i32, %c0_i32_0 : i32, i32
  }
  func.func @transform_4(%arg0: i32) -> (i32, i32) {
    %c0_i32 = arith.constant 0 : i32
    %c0_i32_0 = arith.constant 0 : i32
    %c0_i32_1 = arith.constant 0 : i32
    return %c0_i32, %c0_i32_0 : i32, i32
  }
  func.func @transform_5(%arg0: i32) -> (i32, i32) {
    %c0_i32 = arith.constant 0 : i32
    %c0_i32_0 = arith.constant 0 : i32
    return %c0_i32, %arg0 : i32, i32
  }
}

</mosaic_0001>

<bundles_post_ra>
// kernel: tpu_custom_call.1
= control target key start
LH: loop header
LB: loop body
LE: loop exit
PB: predicated region body
PF: predicated region fallthrough
CT: control target
= control target key end

     0   :  { %v963_v7 = vmov 1983009808   ;;  %v210_v9 = vlaneseq  ;;  %s1552_s0 = inlined_call_operand.vmem [shape: f32[2,1200], index: 0, kind: input, shape index: {}]   ;;  %s1553_s1 = inlined_call_operand.vmem [shape: f32[1200,60], index: 1, kind: input, shape index: {}]   ;;  %s1554_s2 = inlined_call_operand.vmem [shape: f32[1,60], index: 2, kind: input, shape index: {}]   ;;  %s1555_s3 = inlined_call_operand.vmem [shape: f32[8,15], index: 3, kind: input, shape index: {}]   ;;  %s1556_s4 = inlined_call_operand.<no memory space> [shape: f32[1,1], index: 4, kind: input, shape index: {}]   ;;  %s1557_s5 = inlined_call_operand.hbm [shape: bf16[1,8], index: 5, kind: output, shape index: {}]  }
   0x1   :  { %v65_v0 = vld [vmem:[%s1553_s1 + $0xf8] sm:$0xff]  ;;  %v64_v2 = vld [vmem:[%s1553_s1 + $0xf0] sm:$0xff]  ;;  %v63_v4 = vld [vmem:[%s1553_s1 + $0xe8] sm:$0xff]  ;;  %v208_v8 = vunpack.c.l.s4 %v963_v7 }
   0x2   :  { %v49_v1 = vld [vmem:[%s1553_s1 + $0x78] sm:$0xff]  ;;  %774 = vmatprep.subr.mxu1 %v65_v0  ;;  %v48_v3 = vld [vmem:[%s1553_s1 + $0x70] sm:$0xff]  ;;  %v47_v5 = vld [vmem:[%s1553_s1 + $0x68] sm:$0xff]  ;;  %v211_v16 = vshrl.u32 %v210_v9, 7 }
   0x3   :  { %775 = vmatpush3.msra.mxu1 %v49_v1  ;;  %v62_v6 = vld [vmem:[%s1553_s1 + $0xe0] sm:$0xff]  ;;  %v61_v11 = vld [vmem:[%s1553_s1 + $0xd8] sm:$0xff]  ;;  %v60_v13 = vld [vmem:[%s1553_s1 + $0xd0] sm:$0xff]  ;;  %v209_v15 = vunpack.c.0.s8 %v208_v8 }
   0x4   :  { %776 = vmatprep.subr.mxu1 %v64_v2  ;;  %v46_v10 = vld [vmem:[%s1553_s1 + $0x60] sm:$0xff]  ;;  %v45_v12 = vld [vmem:[%s1553_s1 + $0x58] sm:$0xff]  ;;  %v44_v17 = vld [vmem:[%s1553_s1 + $0x50] sm:$0xff] }
   0x5   :  { %777 = vmatpush3.msra.mxu1 %v48_v3  ;;  %v129_v14 = vld [vmem:[%s1553_s1 + $0x2f8] sm:$0xff]  ;;  %v128_v19 = vld [vmem:[%s1553_s1 + $0x2f0] sm:$0xff]  ;;  %v59_v20 = vld [vmem:[%s1553_s1 + $0xc8] sm:$0xff]  ;;  %v1068_v28 = vsub.s32 %v209_v15, %v211_v16 }
   0x6   :  { %778 = vmatprep.subr.mxu1 %v63_v4  ;;  %844 = vmatprep.subr.mxu0 %v129_v14  ;;  %v113_v18 = vld [vmem:[%s1553_s1 + $0x278] sm:$0xff]  ;;  %v112_v21 = vld [vmem:[%s1553_s1 + $0x270] sm:$0xff]  ;;  %v43_v22 = vld [vmem:[%s1553_s1 + $0x48] sm:$0xff] }
   0x7   :  { %779 = vmatpush3.msra.mxu1 %v47_v5  ;;  %845 = vmatpush3.msra.mxu0 %v113_v18  ;;  %v127_v23 = vld [vmem:[%s1553_s1 + $0x2e8] sm:$0xff]  ;;  %v58_v25 = vld [vmem:[%s1553_s1 + $0xc0] sm:$0xff]  ;;  %v57_v29 = vld [vmem:[%s1553_s1 + $0xb8] sm:$0xff] }
   0x8   :  { %780 = vmatprep.subr.mxu1 %v62_v6  ;;  %846 = vmatprep.subr.mxu0 %v128_v19  ;;  %v111_v24 = vld [vmem:[%s1553_s1 + $0x268] sm:$0xff]  ;;  %v42_v26 = vld [vmem:[%s1553_s1 + $0x40] sm:$0xff]  ;;  %v41_v31 = vld [vmem:[%s1553_s1 + $0x38] sm:$0xff] }
   0x9   :  { %781 = vmatpush3.msra.mxu1 %v46_v10  ;;  %847 = vmatpush3.msra.mxu0 %v112_v21  ;;  %v126_v27 = vld [vmem:[%s1553_s1 + $0x2e0] sm:$0xff]  ;;  %v930_v32 = vld [vmem:[%s1552_s0 + $0x28] ss:$20 sps:$4 sm:$0xff]   ;;  %v56_v34 = vld [vmem:[%s1553_s1 + $0xb0] sm:$0xff] }
   0xa   :  { %782 = vmatprep.subr.mxu1 %v61_v11  ;;  %848 = vmatprep.subr.mxu0 %v127_v23  ;;  %v927_v30 = vld [vmem:[%s1552_s0] ss:$20 sps:$4 sm:$0xff]   ;;  %v125_v36 = vld [vmem:[%s1553_s1 + $0x2d8] sm:$0xff]  ;;  %v1098_v38 = vrot.slane %v930_v32, %v1068_v28  ;;  %v55_v41 = vld [vmem:[%s1553_s1 + $0xa8] sm:$0xff] }
   0xb   :  { %783 = vmatpush3.msra.mxu1 %v45_v12  ;;  %849 = vmatpush3.msra.mxu0 %v111_v24  ;;  %v110_v33 = vld [vmem:[%s1553_s1 + $0x260] sm:$0xff]  ;;  %v1089_v35 = vrot.slane %v927_v30, %v1068_v28  ;;  %v40_v37 = vld [vmem:[%s1553_s1 + $0x30] sm:$0xff]  ;;  %v109_v39 = vld [vmem:[%s1553_s1 + $0x258] sm:$0xff] }
   0xc   :  { %784 = vmatprep.subr.mxu1 %v60_v13  ;;  %850 = vmatprep.subr.mxu0 %v126_v27  ;;  %v124_v40 = vld [vmem:[%s1553_s1 + $0x2d0] sm:$0xff]  ;;  %v39_v43 = vld [vmem:[%s1553_s1 + $0x28] sm:$0xff]  ;;  %v54_v46 = vld [vmem:[%s1553_s1 + $0xa0] sm:$0xff] }
   0xd   :  { %785 = vmatpush3.msra.mxu1 %v44_v17  ;;  %851 = vmatpush3.msra.mxu0 %v110_v33  ;;  %v108_v42 = vld [vmem:[%s1553_s1 + $0x250] sm:$0xff]  ;;  %v236_v44 = vcombine.high %v1089_v35, %v1098_v38  ;;  %v123_v45 = vld [vmem:[%s1553_s1 + $0x2c8] sm:$0xff]  ;;  %v38_v48 = vld [vmem:[%s1553_s1 + $0x20] sm:$0xff]  ;;  %v235_v1 = vcombine.low %v1089_v35, %v1098_v38 }
   0xe   :  { %786 = vmatprep.subr.mxu1 %v59_v20  ;;  %852 = vmatprep.subr.mxu0 %v125_v36  ;;  %v107_v47 = vld [vmem:[%s1553_s1 + $0x248] sm:$0xff]  ;;  %v122_v49 = vld [vmem:[%s1553_s1 + $0x2c0] sm:$0xff]  ;;  %v53_v50 = vld [vmem:[%s1553_s1 + $0x98] sm:$0xff] }
   0xf   :  { %787 = vmatpush3.msra.mxu1 %v43_v22  ;;  %853 = vmatpush3.msra.mxu0 %v109_v39  ;;  %v106_v51 = vld [vmem:[%s1553_s1 + $0x240] sm:$0xff]  ;;  %v37_v52 = vld [vmem:[%s1553_s1 + $0x18] sm:$0xff]  ;;  %v52_v54 = vld [vmem:[%s1553_s1 + $0x90] sm:$0xff] }
  0x10   :  { %788 = vmatprep.subr.mxu1 %v58_v25  ;;  %854 = vmatprep.subr.mxu0 %v124_v40  ;;  %v121_v53 = vld [vmem:[%s1553_s1 + $0x2b8] sm:$0xff]  ;;  %v36_v56 = vld [vmem:[%s1553_s1 + $0x10] sm:$0xff]  ;;  %v51_v58 = vld [vmem:[%s1553_s1 + $0x88] sm:$0xff] }
  0x11   :  { %789 = vmatpush3.msra.mxu1 %v42_v26  ;;  %855 = vmatpush3.msra.mxu0 %v108_v42  ;;  %v105_v55 = vld [vmem:[%s1553_s1 + $0x238] sm:$0xff]  ;;  %v120_v57 = vld [vmem:[%s1553_s1 + $0x2b0] sm:$0xff]  ;;  %v35_v60 = vld [vmem:[%s1553_s1 + $0x8] sm:$0xff] }
  0x12   :  { %790 = vmatprep.subr.mxu1 %v57_v29  ;;  %369 = vmatprep.mubr.f32.mxu1 %v236_v44  ;;  %v104_v59 = vld [vmem:[%s1553_s1 + $0x230] sm:$0xff]  ;;  %v119_v61 = vld [vmem:[%s1553_s1 + $0x2a8] sm:$0xff]  ;;  %v50_v62 = vld [vmem:[%s1553_s1 + $0x80] sm:$0xff] }
  0x13   :  { %791 = vmatpush3.msra.mxu1 %v41_v31  ;;  %856 = vmatprep.subr.mxu0 %v123_v45  ;;  %v103_v63 = vld [vmem:[%s1553_s1 + $0x228] sm:$0xff]  ;;  %v34_v0 = vld [vmem:[%s1553_s1] sm:$0xff]  ;;  %v97_v3 = vld [vmem:[%s1553_s1 + $0x1f8] sm:$0xff] }
  0x14   :  { %792 = vmatprep.subr.mxu1 %v56_v34  ;;  %857 = vmatpush3.msra.mxu0 %v107_v47  ;;  %v118_v2 = vld [vmem:[%s1553_s1 + $0x2a0] sm:$0xff]  ;;  %v81_v4 = vld [vmem:[%s1553_s1 + $0x178] sm:$0xff]  ;;  %v96_v5 = vld [vmem:[%s1553_s1 + $0x1f0] sm:$0xff] }
  0x15   :  { %793 = vmatpush3.msra.mxu1 %v40_v37  ;;  %858 = vmatprep.subr.mxu0 %v122_v49  ;;  %v80_v6 = vld [vmem:[%s1553_s1 + $0x170] sm:$0xff]  ;;  %v102_v7 = vld [vmem:[%s1553_s1 + $0x220] sm:$0xff]  ;;  %v117_v8 = vld [vmem:[%s1553_s1 + $0x298] sm:$0xff]  ;;  %v964_v37 = vmov 0.0  }
  0x16   :  { %794 = vmatprep.subr.mxu1 %v55_v41  ;;  %859 = vmatpush3.msra.mxu0 %v106_v51  ;;  %v101_v9 = vld [vmem:[%s1553_s1 + $0x218] sm:$0xff]  ;;  %v95_v11 = vld [vmem:[%s1553_s1 + $0x1e8] sm:$0xff]  ;;  %v116_v12 = vld [vmem:[%s1553_s1 + $0x290] sm:$0xff] }
  0x17   :  { %795 = vmatpush3.msra.mxu1 %v39_v43  ;;  %860 = vmatprep.subr.mxu0 %v121_v53  ;;  %v933_v10 = vld [vmem:[%s1552_s0 + $0x8] ss:$20 sps:$4 sm:$0xff]   ;;  %v936_v13 = vld [vmem:[%s1552_s0 + $0x30] ss:$20 sps:$4 sm:$0xff]   ;;  %v932_v29 = vld [vmem:[%s1552_s0 + $0x2c] ss:$20 sps:$4 sm:$0xff]  }
  0x18   :  { %796 = vmatprep.subr.mxu1 %v54_v46  ;;  %861 = vmatpush3.msra.mxu0 %v105_v55  ;;  %v79_v14 = vld [vmem:[%s1553_s1 + $0x168] sm:$0xff]  ;;  %v100_v15 = vld [vmem:[%s1553_s1 + $0x210] sm:$0xff]  ;;  %v249_v16 = vrot.slane %v933_v10, %v1068_v28  ;;  %v94_v17 = vld [vmem:[%s1553_s1 + $0x1e0] sm:$0xff]  ;;  %v263_v19 = vrot.slane %v936_v13, %v1068_v28  ;;  %v1276_v39 = vrot.slane %v932_v29, %v1068_v28 }
  0x19   :  { %797 = vmatpush3.msra.mxu1 %v38_v48  ;;  %862 = vmatprep.subr.mxu0 %v120_v57  ;;  %v115_v18 = vld [vmem:[%s1553_s1 + $0x288] sm:$0xff]  ;;  %v78_v20 = vld [vmem:[%s1553_s1 + $0x160] sm:$0xff]  ;;  %v93_v22 = vld [vmem:[%s1553_s1 + $0x1d8] sm:$0xff] }
  0x1a   :  { %798 = vmatprep.subr.mxu1 %v53_v50  ;;  %863 = vmatpush3.msra.mxu0 %v104_v59  ;;  %v99_v21 = vld [vmem:[%s1553_s1 + $0x208] sm:$0xff]  ;;  %v114_v23 = vld [vmem:[%s1553_s1 + $0x280] sm:$0xff]  ;;  %v77_v24 = vld [vmem:[%s1553_s1 + $0x158] sm:$0xff]  ;;  %v272_v26 = vcombine.high %v249_v16, %v263_v19  ;;  %v271_v32 = vcombine.low %v249_v16, %v263_v19 }
  0x1b   :  { %799 = vmatpush3.msra.mxu1 %v37_v52  ;;  %864 = vmatprep.subr.mxu0 %v119_v61  ;;  %v98_v25 = vld [vmem:[%s1553_s1 + $0x200] sm:$0xff]  ;;  %v92_v30 = vld [vmem:[%s1553_s1 + $0x1d0] sm:$0xff]  ;;  %v91_v33 = vld [vmem:[%s1553_s1 + $0x1c8] sm:$0xff] }
  0x1c   :  { %800 = vmatprep.subr.mxu1 %v52_v54  ;;  %865 = vmatpush3.msra.mxu0 %v103_v63  ;;  %v929_v27 = vld [vmem:[%s1552_s0 + $0x4] ss:$20 sps:$4 sm:$0xff]   ;;  %v76_v31 = vld [vmem:[%s1553_s1 + $0x150] sm:$0xff]  ;;  %v75_v34 = vld [vmem:[%s1553_s1 + $0x148] sm:$0xff] }
  0x1d   :  { %801 = vmatpush3.msra.mxu1 %v36_v56  ;;  %866 = vmatprep.subr.mxu0 %v118_v2  ;;  %v177_v35 = vld [vmem:[%s1553_s1 + $0x478] sm:$0xff]  ;;  %v90_v36 = vld [vmem:[%s1553_s1 + $0x1c0] sm:$0xff]  ;;  %v1273_v38 = vrot.slane %v929_v27, %v1068_v28  ;;  %v176_v41 = vld [vmem:[%s1553_s1 + $0x470] sm:$0xff] }
  0x1e   :  { %802 = vmatprep.subr.mxu1 %v51_v58  ;;  %867 = vmatpush3.msra.mxu0 %v102_v7  ;;  %v74_v40 = vld [vmem:[%s1553_s1 + $0x140] sm:$0xff]  ;;  %v89_v42 = vld [vmem:[%s1553_s1 + $0x1b8] sm:$0xff]  ;;  %v175_v44 = vld [vmem:[%s1553_s1 + $0x468] sm:$0xff] }
  0x1f   :  { %803 = vmatpush3.msra.mxu1 %v35_v60  ;;  %868 = vmatprep.subr.mxu0 %v117_v8  ;;  %v73_v43 = vld [vmem:[%s1553_s1 + $0x138] sm:$0xff]  ;;  %v88_v45 = vld [vmem:[%s1553_s1 + $0x1b0] sm:$0xff]  ;;  %v238_v46 = vcombine.high %v1273_v38, %v1276_v39  ;;  %v87_v48 = vld [vmem:[%s1553_s1 + $0x1a8] sm:$0xff] }
  0x20   :  { %804 = vmatprep.subr.mxu1 %v50_v62  ;;  %869 = vmatpush3.msra.mxu0 %v101_v9  ;;  %v72_v47 = vld [vmem:[%s1553_s1 + $0x130] sm:$0xff]  ;;  %v174_v49 = vld [vmem:[%s1553_s1 + $0x460] sm:$0xff]  ;;  %v71_v50 = vld [vmem:[%s1553_s1 + $0x128] sm:$0xff] }
  0x21   :  { %805 = vmatpush3.msra.mxu1 %v34_v0  ;;  %870 = vmatprep.subr.mxu0 %v116_v12  ;;  %v86_v51 = vld [vmem:[%s1553_s1 + $0x1a0] sm:$0xff]  ;;  %v173_v52 = vld [vmem:[%s1553_s1 + $0x458] sm:$0xff]  ;;  %v172_v56 = vld [vmem:[%s1553_s1 + $0x450] sm:$0xff] }
  0x22   :  { %370 = vmatmul.mubr.f32.vlgmr.msra.gmra.mxu1 %v235_v1  ;;  %809 = vmatprep.subr.mxu1 %v97_v3  ;;  %v70_v53 = vld [vmem:[%s1553_s1 + $0x120] sm:$0xff]  ;;  %v85_v54 = vld [vmem:[%s1553_s1 + $0x198] sm:$0xff]  ;;  %v84_v57 = vld [vmem:[%s1553_s1 + $0x190] sm:$0xff] }
  0x23   :  { %810 = vmatpush3.msra.mxu1 %v81_v4  ;;  %871 = vmatpush3.msra.mxu0 %v100_v15  ;;  %v69_v55 = vld [vmem:[%s1553_s1 + $0x118] sm:$0xff]  ;;  %v171_v58 = vld [vmem:[%s1553_s1 + $0x448] sm:$0xff]  ;;  %v68_v59 = vld [vmem:[%s1553_s1 + $0x110] sm:$0xff] }
  0x24   :  { %811 = vmatprep.subr.mxu1 %v96_v5  ;;  %872 = vmatprep.subr.mxu0 %v115_v18 }
  0x25   :  { %812 = vmatpush3.msra.mxu1 %v80_v6  ;;  %873 = vmatpush3.msra.mxu0 %v99_v21 }
  0x26   :  { %813 = vmatprep.subr.mxu1 %v95_v11  ;;  %874 = vmatprep.subr.mxu0 %v114_v23 }
  0x27   :  { %814 = vmatpush3.msra.mxu1 %v79_v14  ;;  %875 = vmatpush3.msra.mxu0 %v98_v25 }
  0x28   :  { %815 = vmatprep.subr.mxu1 %v94_v17  ;;  %509 = vmatprep.mubr.f32.mxu0 %v272_v26 }
  0x29   :  { %816 = vmatpush3.msra.mxu1 %v78_v20  ;;  %585 = vmatprep.subr.mxu0 %v964_v37 }
  0x2a   :  { %817 = vmatprep.subr.mxu1 %v93_v22  ;;  %510 = vmatmul.mubr.f32.vlgmr.msra.gmra.mxu0 %v271_v32 }
  0x2b   :  { %818 = vmatpush3.msra.mxu1 %v77_v24  ;;  %586 = vmatpush1.msra.mxu0 %v177_v35 }
  0x2c   :  { %819 = vmatprep.subr.mxu1 %v92_v30  ;;  %587 = vmatprep.subr.mxu0 %v964_v37 }
  0x2d   :  { %820 = vmatpush3.msra.mxu1 %v76_v31  ;;  %588 = vmatpush1.msra.mxu0 %v176_v41 }
  0x2e   :  { %821 = vmatprep.subr.mxu1 %v91_v33  ;;  %589 = vmatprep.subr.mxu0 %v964_v37 }
  0x2f   :  { %822 = vmatpush3.msra.mxu1 %v75_v34  ;;  %590 = vmatpush1.msra.mxu0 %v175_v44 }
  0x30   :  { %823 = vmatprep.subr.mxu1 %v90_v36  ;;  %591 = vmatprep.subr.mxu0 %v964_v37 }
  0x31   :  { %824 = vmatpush3.msra.mxu1 %v74_v40  ;;  %439 = vmatprep.mubr.f32.mxu1 %v238_v46 }
  0x32   :  { %825 = vmatprep.subr.mxu1 %v89_v42  ;;  %592 = vmatpush1.msra.mxu0 %v174_v49 }
  0x33   :  { %826 = vmatpush3.msra.mxu1 %v73_v43  ;;  %593 = vmatprep.subr.mxu0 %v964_v37 }
  0x34   :  { %827 = vmatprep.subr.mxu1 %v88_v45  ;;  %594 = vmatpush1.msra.mxu0 %v173_v52 }
  0x35   :  { %828 = vmatpush3.msra.mxu1 %v72_v47  ;;  %595 = vmatprep.subr.mxu0 %v964_v37 }
  0x36   :  { %829 = vmatprep.subr.mxu1 %v87_v48  ;;  %596 = vmatpush1.msra.mxu0 %v172_v56 }
  0x37   :  { %830 = vmatpush3.msra.mxu1 %v71_v50 }
  0x38   :  { %831 = vmatprep.subr.mxu1 %v86_v51 }
  0x39   :  { %832 = vmatpush3.msra.mxu1 %v70_v53 }
  0x3a   :  { %833 = vmatprep.subr.mxu1 %v85_v54 }
  0x3b   :  { %11 = vsyncpa [#allocation4], 0  ;;  %834 = vmatpush3.msra.mxu1 %v69_v55  ;;  %v83_v60 = vld [vmem:[%s1553_s1 + $0x188] sm:$0xff]  ;;  %597 = vmatprep.subr.mxu0 %v964_v37  ;;  %v170_v61 = vld [vmem:[%s1553_s1 + $0x440] sm:$0xff]  ;;  %v237_v2 = vcombine.low %v1273_v38, %v1276_v39  ;;  %vm302_vm0 = vcmask 392192   ;;  %vm966_vm1 = vmmov 0  }
  0x3c   :  { %835 = vmatprep.subr.mxu1 %v84_v57  ;;  %v67_v62 = vld [vmem:[%s1553_s1 + $0x108] sm:$0xff]  ;;  %598 = vmatpush1.msra.mxu0 %v171_v58  ;;  %v82_v63 = vld [vmem:[%s1553_s1 + $0x180] sm:$0xff]  ;;  %v169_v0 = vld [vmem:[%s1553_s1 + $0x438] sm:$0xff]  ;;  %vm667_vm2 = vcmask 121856   ;;  %vm750_vm3 = vcmask 57344   ;;  %s968_s17 = smov [#allocation3]  }
  0x3d   :  { %836 = vmatpush3.msra.mxu1 %v68_v59  ;;  %599 = vmatprep.subr.mxu0 %v964_v37  ;;  %v66_v1 = vld [vmem:[%s1553_s1 + $0x100] sm:$0xff]  ;;  %v161_v3 = vld [vmem:[%s1553_s1 + $0x3f8] sm:$0xff]  ;;  %v168_v5 = vld [vmem:[%s1553_s1 + $0x430] sm:$0xff]  ;;  %vm751_vm4 = vsmask.f32 256  ;;  %s762_s18 = sshll.u32 %s968_s17, 4  ;;  %s763_s18 = int_to_ptr.vmem [resolvable:$true] %s762_s18 }
  0x3e   :  { %837 = vmatprep.subr.mxu1 %v83_v60  ;;  %600 = vmatpush1.msra.mxu0 %v170_v61  ;;  %v145_v4 = vld [vmem:[%s1553_s1 + $0x378] sm:$0xff]  ;;  %v160_v6 = vld [vmem:[%s1553_s1 + $0x3f0] sm:$0xff]  ;;  %v167_v8 = vld [vmem:[%s1553_s1 + $0x428] sm:$0xff]  ;;  %s945_s19 = scalar_lea.vmem %s763_s18, 32  ;;  %p946_p1 = scmp.lt.s32.totalorder %s763_s18, %s763_s18 }
  0x3f   :  { %838 = vmatpush3.msra.mxu1 %v67_v62  ;;  %601 = vmatprep.subr.mxu0 %v964_v37  ;;  %v144_v7 = vld [vmem:[%s1553_s1 + $0x370] sm:$0xff]  ;;  %v159_v9 = vld [vmem:[%s1553_s1 + $0x3e8] sm:$0xff]  ;;  %v166_v11 = vld [vmem:[%s1553_s1 + $0x420] sm:$0xff] }
  0x40   :  { %839 = vmatprep.subr.mxu1 %v82_v63  ;;  %602 = vmatpush1.msra.mxu0 %v169_v0  ;;  %v143_v10 = vld [vmem:[%s1553_s1 + $0x368] sm:$0xff]  ;;  %v158_v12 = vld [vmem:[%s1553_s1 + $0x3e0] sm:$0xff]  ;;  %v165_v14 = vld [vmem:[%s1553_s1 + $0x418] sm:$0xff] }
  0x41   :  { %840 = vmatpush3.msra.mxu1 %v66_v1  ;;  %603 = vmatprep.subr.mxu0 %v964_v37  ;;  %v142_v13 = vld [vmem:[%s1553_s1 + $0x360] sm:$0xff]  ;;  %v157_v15 = vld [vmem:[%s1553_s1 + $0x3d8] sm:$0xff]  ;;  %v164_v17 = vld [vmem:[%s1553_s1 + $0x410] sm:$0xff] }
  0x42   :  { %440 = vmatmul.mubr.f32.vlgmr.msra.gmra.mxu1 %v237_v2  ;;  %879 = vmatprep.subr.mxu1 %v161_v3  ;;  %v141_v16 = vld [vmem:[%s1553_s1 + $0x358] sm:$0xff]  ;;  %v156_v18 = vld [vmem:[%s1553_s1 + $0x3d0] sm:$0xff]  ;;  %v163_v20 = vld [vmem:[%s1553_s1 + $0x408] sm:$0xff] }
  0x43   :  { %880 = vmatpush3.msra.mxu1 %v145_v4  ;;  %604 = vmatpush1.msra.mxu0 %v168_v5  ;;  %v140_v19 = vld [vmem:[%s1553_s1 + $0x350] sm:$0xff]  ;;  %v935_v21 = vld [vmem:[%s1552_s0 + $0xc] ss:$20 sps:$4 sm:$0xff]   ;;  %v153_v30 = vld [vmem:[%s1553_s1 + $0x3b8] sm:$0xff] }
  0x44   :  { %881 = vmatprep.subr.mxu1 %v160_v6  ;;  %605 = vmatprep.subr.mxu0 %v964_v37  ;;  %v938_v22 = vld [vmem:[%s1552_s0 + $0x34] ss:$20 sps:$4 sm:$0xff]   ;;  %v162_v25 = vld [vmem:[%s1553_s1 + $0x400] sm:$0xff]  ;;  %v1454_v31 = vrot.slane %v935_v21, %v1068_v28  ;;  %v137_v33 = vld [vmem:[%s1553_s1 + $0x338] sm:$0xff] }
  0x45   :  { %882 = vmatpush3.msra.mxu1 %v144_v7  ;;  %606 = vmatpush1.msra.mxu0 %v167_v8  ;;  %v155_v23 = vld [vmem:[%s1553_s1 + $0x3c8] sm:$0xff]  ;;  %v154_v26 = vld [vmem:[%s1553_s1 + $0x3c0] sm:$0xff]  ;;  %v1457_v32 = vrot.slane %v938_v22, %v1068_v28  ;;  %v152_v35 = vld [vmem:[%s1553_s1 + $0x3b0] sm:$0xff] }
  0x46   :  { %883 = vmatprep.subr.mxu1 %v159_v9  ;;  %607 = vmatprep.subr.mxu0 %v964_v37  ;;  %v139_v24 = vld [vmem:[%s1553_s1 + $0x348] sm:$0xff]  ;;  %v138_v27 = vld [vmem:[%s1553_s1 + $0x340] sm:$0xff]  ;;  %v136_v39 = vld [vmem:[%s1553_s1 + $0x330] sm:$0xff] }
  0x47   :  { %884 = vmatpush3.msra.mxu1 %v143_v10  ;;  %608 = vmatpush1.msra.mxu0 %v166_v11  ;;  %v183_v29 = vld [vmem:[%s1553_s1 + $0x4a8] sm:$0xff]  ;;  %v182_v34 = vld [vmem:[%s1553_s1 + $0x4a0] sm:$0xff]  ;;  %v181_v40 = vld [vmem:[%s1553_s1 + $0x498] sm:$0xff]  ;;  %v274_v42 = vcombine.high %v1454_v31, %v1457_v32  ;;  %v273_v60 = vcombine.low %v1454_v31, %v1457_v32 }
  0x48   :  { %885 = vmatprep.subr.mxu1 %v158_v12  ;;  %609 = vmatprep.subr.mxu0 %v964_v37  ;;  %v939_v36 = vld [vmem:[%s1552_s0 + $0x10] ss:$20 sps:$4 sm:$0xff]   ;;  %v940_v38 = vld [vmem:[%s1552_s0 + $0x38] ss:$20 sps:$4 sm:$0xff]   ;;  %v770_v3 = vld [vmem:[%s1554_s2] ss:$0 sm:$0xff] }
  0x49   :  { %886 = vmatpush3.msra.mxu1 %v142_v13  ;;  %610 = vmatpush1.msra.mxu0 %v165_v14  ;;  %v151_v41 = vld [vmem:[%s1553_s1 + $0x3a8] sm:$0xff]  ;;  %v150_v44 = vld [vmem:[%s1553_s1 + $0x3a0] sm:$0xff]  ;;  %v180_v45 = vld [vmem:[%s1553_s1 + $0x490] sm:$0xff]  ;;  %v283_v46 = vrot.slane %v939_v36, %v1068_v28  ;;  %v290_v47 = vrot.slane %v940_v38, %v1068_v28  ;;  %s967_s2 = smov 98  }
  0x4a   :  { %887 = vmatprep.subr.mxu1 %v157_v15  ;;  %611 = vmatprep.subr.mxu0 %v964_v37  ;;  %v135_v43 = vld [vmem:[%s1553_s1 + $0x328] sm:$0xff]  ;;  %v134_v48 = vld [vmem:[%s1553_s1 + $0x320] sm:$0xff]  ;;  %v149_v49 = vld [vmem:[%s1553_s1 + $0x398] sm:$0xff] }
  0x4b   :  { %888 = vmatpush3.msra.mxu1 %v141_v16  ;;  %612 = vmatpush1.msra.mxu0 %v164_v17  ;;  %v179_v50 = vld [vmem:[%s1553_s1 + $0x488] sm:$0xff]  ;;  %v133_v28 = vld [vmem:[%s1553_s1 + $0x318] sm:$0xff]  ;;  %v148_v51 = vld [vmem:[%s1553_s1 + $0x390] sm:$0xff]  ;;  %v292_v53 = vcombine.high %v283_v46, %v290_v47  ;;  %v291_v55 = vcombine.low %v283_v46, %v290_v47 }
  0x4c   :  { %889 = vmatprep.subr.mxu1 %v156_v18  ;;  %613 = vmatprep.subr.mxu0 %v964_v37  ;;  %v178_v52 = vld [vmem:[%s1553_s1 + $0x480] sm:$0xff]  ;;  %v132_v54 = vld [vmem:[%s1553_s1 + $0x310] sm:$0xff]  ;;  %v147_v56 = vld [vmem:[%s1553_s1 + $0x388] sm:$0xff] }
  0x4d   :  { %890 = vmatpush3.msra.mxu1 %v140_v19  ;;  %614 = vmatpush1.msra.mxu0 %v163_v20  ;;  %v131_v57 = vld [vmem:[%s1553_s1 + $0x308] sm:$0xff]  ;;  %v146_v58 = vld [vmem:[%s1553_s1 + $0x380] sm:$0xff]  ;;  %vm752_vm6 = vmand %vm750_vm3, %vm751_vm4 }
  0x4e   :  { %891 = vmatprep.subr.mxu1 %v155_v23  ;;  %615 = vmatprep.subr.mxu0 %v964_v37  ;;  %v130_v59 = vld [vmem:[%s1553_s1 + $0x300] sm:$0xff]  ;;  %s965_s1 = smov 113   ;;  %v745_v23 = vstv %s1556_s4 }
  0x4f   :  { %892 = vmatpush3.msra.mxu1 %v139_v24  ;;  %616 = vmatpush1.msra.mxu0 %v162_v25  ;;  %v666_v22 = vld [vmem:[%s1555_s3] sm:$0xff]  ;;  %s941_s3 = scalar_lea.vmem %s763_s18, 16 }
  0x50   :  { %893 = vmatprep.subr.mxu1 %v154_v26  ;;  %637 = vmatprep.subr.mxu0 %v964_v37  ;;  %p942_p0 = scmp.ne.s32.totalorder %s763_s18, %s941_s3  ;;  %p947_p2 = scmp.lt.s32.totalorder %s945_s19, %s941_s3 }
  0x51   :  { %894 = vmatpush3.msra.mxu1 %v138_v27  ;;  %638 = vmatpush2.msra.mxu0 %v183_v29  ;;  %v753_v29 = vld [vmem:[#allocation3] sm:$0x1] }
  0x52   :  { %895 = vmatprep.subr.mxu1 %v153_v30  ;;  %639 = vmatprep.subr.mxu0 %v964_v37  ;;  %p948_p3 = por %p947_p2, %p946_p1 }
  0x53   :  { %896 = vmatpush3.msra.mxu1 %v137_v33  ;;  %640 = vmatpush2.msra.mxu0 %v182_v34 }
  0x54   :  { %897 = vmatprep.subr.mxu1 %v152_v35  ;;  %641 = vmatprep.subr.mxu0 %v964_v37  ;;  %p949_p4 = pnand %p948_p3, %p942_p0 }
  0x55   :  { %898 = vmatpush3.msra.mxu1 %v136_v39  ;;  %642 = vmatpush2.msra.mxu0 %v181_v40 }
  0x56   :  { %899 = vmatprep.subr.mxu1 %v151_v41  ;;  %643 = vmatprep.subr.mxu0 %v964_v37 }
  0x57   :  { %900 = vmatpush3.msra.mxu1 %v135_v43  ;;  %579 = vmatprep.mubr.f32.mxu1 %v274_v42 }
  0x58   :  { %901 = vmatprep.subr.mxu1 %v150_v44  ;;  %644 = vmatpush2.msra.mxu0 %v180_v45 }
  0x59   :  { %902 = vmatpush3.msra.mxu1 %v134_v48  ;;  %645 = vmatprep.subr.mxu0 %v964_v37 }
  0x5a   :  { %903 = vmatprep.subr.mxu1 %v149_v49  ;;  %646 = vmatpush2.msra.mxu0 %v179_v50 }
  0x5b   :  { %904 = vmatpush3.msra.mxu1 %v133_v28  ;;  %647 = vmatprep.subr.mxu0 %v964_v37 }
  0x5c   :  { %905 = vmatprep.subr.mxu1 %v148_v51  ;;  %648 = vmatpush2.msra.mxu0 %v178_v52 }
  0x5d   :  { %906 = vmatpush3.msra.mxu1 %v132_v54  ;;  %771 = vmatprep.mubr.msk.f32.mxu0 %vm302_vm0, %v292_v53 }
  0x5e   :  { %907 = vmatprep.subr.mxu1 %v147_v56  ;;  %650 = vmatmul.mubr.f32.vlgmr.msra.gmra.mxu0 %v291_v55 }
  0x5f   :  { %908 = vmatpush3.msra.mxu1 %v131_v57  ;;  %916 = vmatprep.subr.mxu0 %v964_v37 }
  0x60   :  { %909 = vmatprep.subr.mxu1 %v146_v58  ;;  %918 = vmatprep.mubr.msk.f32.mxu0 %vm966_vm1, %v964_v37 }
  0x61   :  { %910 = vmatpush3.msra.mxu1 %v130_v59 }
  0x62   :  { %580 = vmatmul.mubr.f32.vlgmr.msra.gmra.mxu1 %v273_v60 }
  0xe2   :  { %v806_v61 = vpop.f32.mrf.mxu1 }
  0xe4   :  { %v807_v62 = vpop.f32.mrf.mxu1 }
  0xe5   :  { %v808_v2 = vadd.f32 %v807_v62, %v806_v61 }
  0xe7   :  { %v372_v7 = vadd.f32 %v808_v2, %v770_v3 }
  0xea   :  { %v876_v0 = vpop.f32.mrf.mxu0 }
  0xec   :  { %v877_v4 = vpop.f32.mrf.mxu0 }
  0xed   :  { %v878_v11 = vadd.f32 %v877_v4, %v876_v0 }
 0x102   :  { %v841_v63 = vpop.f32.mrf.mxu1 }
 0x104   :  { %v842_v1 = vpop.f32.mrf.mxu1 }
 0x105   :  { %v843_v5 = vadd.f32 %v842_v1, %v841_v63 }
 0x107   :  { %v442_v9 = vadd.f32 %v843_v5, %v372_v7 }
 0x109   :  { %v512_v14 = vadd.f32 %v878_v11, %v442_v9 }
 0x11e   :  { %v651_v6 = vpop.f32.mrf.mxu0 }
 0x120   :  { %v653_v8 = vpop.f32.mrf.mxu0 }
 0x122   :  { %v911_v10 = vpop.f32.mrf.mxu1 }
 0x124   :  { %v912_v12 = vpop.f32.mrf.mxu1 }
 0x125   :  { %v913_v13 = vadd.f32 %v912_v12, %v911_v10 }
 0x127   :  { %v582_v15 = vadd.f32 %v913_v13, %v512_v14 }
 0x129   :  { %v652_v16 = vadd.f32 %v651_v6, %v582_v15 }
 0x12b   :  { %v655_v17 = vmax.f32 %v652_v16, 0.0 }
 0x12d   :  { %657 = vrot.lane.b32.xlu0 %v655_v17, %s965_s1 }
 0x19f   :  { %v658_v18 = vpop.permute.xlu0 %657 }
 0x1a0   :  { %v660_v19 = vmax.f32 %v655_v17, %v658_v18 }
 0x1a2   :  { %662 = vrot.lane.b32.xlu0 %v660_v19, %s967_s2 }
 0x214   :  { %v663_v20 = vpop.permute.xlu0 %662 }
 0x215   :  { %v665_v21 = vmax.f32 %v660_v19, %v663_v20 }
 0x217   :  { %917 = vmatpush3.xpose.msk.msra.mxu0 %vm667_vm2, %v665_v21 }
 0x21a   :  { %919 = vmatmul.mubr.msk.f32.vlgmr.msra.gmra.mxu0 %vm667_vm2, %v666_v22 }
 0x2da   :  { %v740_v24 = vpop.f32.mrf.mxu0 }
 0x2db   :  { %v746_v25 = vadd.f32 %v745_v23, %v740_v24 }
 0x2dc   :  { %v920_v26 = vpop.f32.mrf.mxu0 }
 0x2dd   :  { %vm747_vm5 = vcmp.gt.f32.partialorder %v746_v25, 0.5 }
 0x2de   :  { %v748_v27 = vsel %vm747_vm5, 1.0, %v964_v37 }
 0x2df   :  { %v749_v30 = vpack.c.bf16 %v748_v27, %v748_v27 }
 0x2e1   :  { %v754_v31 = vsel %vm752_vm6, %v749_v30, %v753_v29 }
 0x2e2   :  { %755 = vst [vmem:[#allocation3] sm:$0x1] %v754_v31 }
 0x2e3   :  { %952 = shalt.err (!%p949_p4)
}
 0x2e4   :  { %765 = dma.vmem_to_hbm [thread:$0]  %s763_s18, 16, %s1557_s5, [#allocation4]  }
 0x2e5   :  { %961 = dma.done.wait [#allocation4], 16  }
 0x2e6   :  { %962 = vsyncadd [#allocation4], 4294967280 }
 0x2e7   :  { %769 = vsyncpa [#allocation4], 1 }

</bundles_post_ra>
